<compile_context>
chip_gen: v7x
topology: tpu7x:2x2x1
jax: 0.10.0
libtpu: 0.0.40
codegen_flags: <defaults>
</compile_context>

<pallas_src>
import functools
import math

import jax
import jax.numpy as jnp
from jax import lax
from jax.experimental import pallas as pl
from jax.experimental.pallas import tpu as pltpu


def _round_up(x, m):
    return (x + m - 1) // m * m


def _vmem_limit_bytes(n_pad, tm, hc, fin):
    """Rough per-call VMEM need (double-buffered inputs + f32 intermediates)."""
    est = (8 * n_pad * hc          # k,v full (bf16, 2 bufs)
           + 16 * tm * n_pad       # cnt tile (bf16, 2 bufs) + score/p f32 temps
           + 24 * tm * hc          # q/skip/out tiles
           + 16 * fin * hc         # fused weights (bf16, 2 bufs)
           + 16 * tm * hc)         # proj f32 temp
    try:
        cap = int(pltpu.get_tpu_info().vmem_capacity_bytes)
    except Exception:  # older jax / query unavailable
        cap = 64 * 1024 * 1024
    hi = max(32 * 1024 * 1024, cap - 16 * 1024 * 1024)
    return int(min(max(32 * 1024 * 1024, 2 * est), hi))


# --------------------------- projection kernel --------------------------------
def _proj_kernel(x_ref, w_ref, b_ref, q_ref, k_ref, v_ref, s_ref, *, hc):
    # One wide lane-dense [q|k|v|skip] matmul; bf16 MXU inputs, f32 accumulate,
    # bias added in f32.  (1/sqrt(C) is already folded into the q columns of W/b.)
    proj = jnp.dot(x_ref[...].astype(jnp.bfloat16), w_ref[...],
                   preferred_element_type=jnp.float32) + b_ref[...]
    q_ref[...] = proj[:, 0 * hc:1 * hc].astype(jnp.bfloat16)
    k_ref[...] = proj[:, 1 * hc:2 * hc].astype(jnp.bfloat16)
    v_ref[...] = proj[:, 2 * hc:3 * hc].astype(jnp.bfloat16)
    s_ref[...] = proj[:, 3 * hc:4 * hc]          # skip stays f32 (added in f32)


# --------------------------- attention kernel ----------------------------------
def _attn_kernel(q_ref, skip_ref, k_ref, v_ref, cnt_ref, out_ref, *, heads, ch, relu):
    cntf = cnt_ref[...].astype(jnp.float32)      # counts exact in bf16 (<= 256)
    mask = cntf > 0.0                            # hoisted: one compare for all heads
    neg = jnp.float32(-1e30)
    for h in range(heads):                       # heads is tiny; static unroll
        qh = q_ref[:, h * ch:(h + 1) * ch]       # bf16, pre-scaled
        kh = k_ref[:, h * ch:(h + 1) * ch]
        vh = v_ref[:, h * ch:(h + 1) * ch]
        # s[i, j] = <q_i, k_j>  (bf16 MXU, f32 out); softmax math stays f32.
        s = lax.dot_general(qh, kh, (((1,), (1,)), ((), ())),
                            preferred_element_type=jnp.float32)
        s = jnp.where(mask, s, neg)
        m = jnp.max(s, axis=-1, keepdims=True)
        p = cntf * jnp.exp(s - m)                # duplicate-edge multiplicity
        den = jnp.maximum(jnp.sum(p, axis=-1, keepdims=True), 1e-30)
        # Normalize AFTER the V matmul: TMxC multiply instead of an N^2 one.
        agg = jnp.dot(p.astype(jnp.bfloat16), vh, preferred_element_type=jnp.float32)
        o = agg * pl.reciprocal(den, approx=True) + skip_ref[:, h * ch:(h + 1) * ch]
        if relu:
            o = jnp.maximum(o, 0.0)
        out_ref[:, h * ch:(h + 1) * ch] = o      # per-head slice store; no concat


# --------------------------- one TransformerConv layer -------------------------
def _transformer_conv_layer(x, cnt_bf16, w_bf16, b_f32, *, heads, ch, relu, tm):
    n_pad, fin = x.shape
    hc = heads * ch
    grid = (n_pad // tm,)
    vmem_lim = _vmem_limit_bytes(n_pad, tm, hc, fin)
    cparams = pltpu.CompilerParams(dimension_semantics=("parallel",),
                                   vmem_limit_bytes=vmem_lim)

    q, k, v, skip = pl.pallas_call(
        functools.partial(_proj_kernel, hc=hc),
        grid=grid,
        in_specs=[pl.BlockSpec((tm, fin), lambda i: (i, 0)),
                  pl.BlockSpec((fin, 4 * hc), lambda i: (0, 0)),
                  pl.BlockSpec((1, 4 * hc), lambda i: (0, 0))],
        out_specs=(pl.BlockSpec((tm, hc), lambda i: (i, 0)),
                   pl.BlockSpec((tm, hc), lambda i: (i, 0)),
                   pl.BlockSpec((tm, hc), lambda i: (i, 0)),
                   pl.BlockSpec((tm, hc), lambda i: (i, 0))),
        out_shape=(jax.ShapeDtypeStruct((n_pad, hc), jnp.bfloat16),
                   jax.ShapeDtypeStruct((n_pad, hc), jnp.bfloat16),
                   jax.ShapeDtypeStruct((n_pad, hc), jnp.bfloat16),
                   jax.ShapeDtypeStruct((n_pad, hc), jnp.float32)),
        compiler_params=cparams,
    )(x, w_bf16, b_f32)

    out = pl.pallas_call(
        functools.partial(_attn_kernel, heads=heads, ch=ch, relu=relu),
        grid=grid,
        in_specs=[pl.BlockSpec((tm, hc), lambda i: (i, 0)),       # q     (row tile)
                  pl.BlockSpec((tm, hc), lambda i: (i, 0)),       # skip  (row tile)
                  pl.BlockSpec((n_pad, hc), lambda i: (0, 0)),    # k     (all nodes)
                  pl.BlockSpec((n_pad, hc), lambda i: (0, 0)),    # v     (all nodes)
                  pl.BlockSpec((tm, n_pad), lambda i: (i, 0))],   # cnt rows (bf16)
        out_specs=pl.BlockSpec((tm, hc), lambda i: (i, 0)),
        out_shape=jax.ShapeDtypeStruct((n_pad, hc), jnp.float32),
        compiler_params=cparams,
    )(q, skip, k, v, cnt_bf16)
    return out


# --------------------------- full encoder ---------------------------------------
def gnn_encoder4(x, edge_index, params, *, heads, hidden, out_ch, row_tile=256):
    n, fin = x.shape
    tm = min(row_tile, _round_up(n, 16))
    n_pad = _round_up(n, tm)

    src, dst = edge_index[0], edge_index[1]
    # cnt[i, j] = number of edges j -> i (PyG softmax over incoming edges).
    # bf16 halves the dominant N^2 DMA; exact for multiplicities <= 256.
    # TODO(synk): cache this scatter per static graph / use an edge-list path for huge N.
    cnt = jnp.zeros((n_pad, n_pad), jnp.float32).at[dst, src].add(1.0)
    cnt = cnt.astype(jnp.bfloat16)

    xp = jnp.zeros((n_pad, fin), jnp.float32).at[:n].set(x).astype(jnp.bfloat16)

    def prep(w, b, ch):
        # Fold 1/sqrt(ch) into the query columns (param prep, not per-element work),
        # then cast the fused weights to bf16 for the MXU.
        hc = heads * ch
        scale = 1.0 / math.sqrt(ch)
        w = w.at[:, :hc].multiply(scale)
        b = b.at[:, :hc].multiply(scale)
        return w.astype(jnp.bfloat16), b.astype(jnp.float32)

    w1, b1 = prep(params["w1"], params["b1"], hidden)
    w2, b2 = prep(params["w2"], params["b2"], out_ch)

    h1 = _transformer_conv_layer(xp, cnt, w1, b1, heads=heads, ch=hidden,
                                 relu=True, tm=tm)
    h2 = _transformer_conv_layer(h1, cnt, w2, b2, heads=heads, ch=out_ch,
                                 relu=False, tm=tm)
    return h2[:n]


def init_params(key, in_ch, hidden, out_ch, heads):
    """Fused weights per layer: columns = [W_q | W_k | W_v | W_skip]; biases likewise."""
    k1, k2, k3, k4 = jax.random.split(key, 4)
    s = 0.1
    return {
        "w1": s * jax.random.normal(k1, (in_ch, 4 * heads * hidden), jnp.float32),
        "b1": s * jax.random.normal(k2, (1, 4 * heads * hidden), jnp.float32),
        "w2": s * jax.random.normal(k3, (heads * hidden, 4 * heads * out_ch), jnp.float32),
        "b2": s * jax.random.normal(k4, (1, 4 * heads * out_ch), jnp.float32),
    }


# ---------------- pure-JAX, edge-list reference (PyG semantics, f32) ---------------- #
def reference_forward(x, edge_index, params, *, heads, hidden, out_ch):
    n = x.shape[0]
    src, dst = edge_index[0], edge_index[1]

    def layer(xin, w, b, ch, relu):
        hc = heads * ch
        proj = xin @ w + b
        q = proj[:, 0 * hc:1 * hc].reshape(n, heads, ch)
        k = proj[:, 1 * hc:2 * hc].reshape(n, heads, ch)
        v = proj[:, 2 * hc:3 * hc].reshape(n, heads, ch)
        skip = proj[:, 3 * hc:4 * hc]
        score = (q[dst] * k[src]).sum(-1) / jnp.sqrt(jnp.float32(ch))   # [E, H]
        smax = jax.ops.segment_max(score, dst, num_segments=n)
        smax = jnp.where(jnp.isfinite(smax), smax, 0.0)
        ex = jnp.exp(score - smax[dst])
        den = jax.ops.segment_sum(ex, dst, num_segments=n)
        attn = ex / jnp.maximum(den[dst], 1e-30)                        # [E, H]
        msg = v[src] * attn[:, :, None]                                 # [E, H, C]
        agg = jax.ops.segment_sum(msg, dst, num_segments=n).reshape(n, hc)
        out = agg + skip
        return jnp.maximum(out, 0.0) if relu else out

    h1 = layer(x, params["w1"], params["b1"], hidden, True)
    return layer(h1, params["w2"], params["b2"], out_ch, False)


if __name__ == "__main__":
    num_nodes = 8
    in_channels = 16
    hidden_channels = 32
    out_channels = 16
    heads = 2
    num_edges = 16

    key = jax.random.PRNGKey(0)
    kx, ke, kp = jax.random.split(key, 3)
    x = jax.random.normal(kx, (num_nodes, in_channels), jnp.float32)
    edge_index = jax.random.randint(ke, (2, num_edges), 0, num_nodes)

    params = init_params(kp, in_channels, hidden_channels, out_channels, heads)

    out = gnn_encoder4(x, edge_index, params,
                       heads=heads, hidden=hidden_channels, out_ch=out_channels)
    out = jax.block_until_ready(out)

    ref = reference_forward(x, edge_index, params,
                            heads=heads, hidden=hidden_channels, out_ch=out_channels)
    assert out.shape == (num_nodes, heads * out_channels)
    # bf16 MXU operands -> compare against the f32 reference with a loose tolerance.
    err = float(jnp.max(jnp.abs(out - ref)))
    assert jnp.allclose(out, ref, atol=3e-2, rtol=3e-2), err

    print("KERNEL_OK")
</pallas_src>

<mosaic_0001>
module attributes {stable_mosaic.version = 11 : i64} {
  func.func @_proj_kernel(%arg0: i32, %arg1: memref<16x16xbf16, #tpu.memory_space<vmem>>, %arg2: memref<16x256xbf16, #tpu.memory_space<vmem>>, %arg3: memref<1x256xf32, #tpu.memory_space<vmem>>, %arg4: memref<16x64xbf16, #tpu.memory_space<vmem>>, %arg5: memref<16x64xbf16, #tpu.memory_space<vmem>>, %arg6: memref<16x64xbf16, #tpu.memory_space<vmem>>, %arg7: memref<16x64xf32, #tpu.memory_space<vmem>>) attributes {dimension_semantics = [#tpu.dimension_semantics<parallel>], iteration_bounds = array<i64: 1>, scalar_prefetch = 0 : i64, scratch_operands = 0 : i64, tpu.core_type = #tpu.core_type<tc>, window_params = [{transform_indices = @transform_0, window_bounds = array<i64: 16, 16>}, {pipeline_mode = #tpu.pipeline_mode<synchronous>, transform_indices = @transform_1, window_bounds = array<i64: 16, 256>}, {pipeline_mode = #tpu.pipeline_mode<synchronous>, transform_indices = @transform_2, window_bounds = array<i64: 1, 256>}, {transform_indices = @transform_3, window_bounds = array<i64: 16, 64>}, {transform_indices = @transform_4, window_bounds = array<i64: 16, 64>}, {transform_indices = @transform_5, window_bounds = array<i64: 16, 64>}, {transform_indices = @transform_6, window_bounds = array<i64: 16, 64>}]} {
    %c0 = arith.constant 0 : index
    %c0_0 = arith.constant 0 : index
    %0 = vector.load %arg1[%c0, %c0_0] : memref<16x16xbf16, #tpu.memory_space<vmem>>, vector<16x16xbf16>
    %c0_1 = arith.constant 0 : index
    %c0_2 = arith.constant 0 : index
    %1 = vector.load %arg2[%c0_1, %c0_2] : memref<16x256xbf16, #tpu.memory_space<vmem>>, vector<16x256xbf16>
    %cst = arith.constant dense<0.000000e+00> : vector<16x256xf32>
    %2 = tpu.matmul %0, %1, %cst {dimension_numbers = #tpu.dot_dimension_numbers<[1], [0], [0], [1], [0, 0, 1, 1], [], []>} : vector<16x16xbf16>, vector<16x256xbf16>, vector<16x256xf32> -> vector<16x256xf32>
    %c0_3 = arith.constant 0 : index
    %c0_4 = arith.constant 0 : index
    %3 = vector.load %arg3[%c0_3, %c0_4] : memref<1x256xf32, #tpu.memory_space<vmem>>, vector<1x256xf32>
    %4 = vector.broadcast %3 : vector<1x256xf32> to vector<16x256xf32>
    %5 = arith.addf %2, %4 : vector<16x256xf32>
    %6 = vector.extract_strided_slice %5 {offsets = [0, 0], sizes = [16, 64], strides = [1, 1]} : vector<16x256xf32> to vector<16x64xf32>
    %7 = arith.truncf %6 : vector<16x64xf32> to vector<16x64xbf16>
    %c0_5 = arith.constant 0 : index
    %c0_6 = arith.constant 0 : index
    %8 = vector.load %arg4[%c0_5, %c0_6] : memref<16x64xbf16, #tpu.memory_space<vmem>>, vector<16x64xbf16>
    tpu.vector_store %arg4[%c0_5, %c0_6], %7 {strides = array<i32>} : memref<16x64xbf16, #tpu.memory_space<vmem>>, vector<16x64xbf16>,
    %9 = vector.extract_strided_slice %5 {offsets = [0, 64], sizes = [16, 64], strides = [1, 1]} : vector<16x256xf32> to vector<16x64xf32>
    %10 = arith.truncf %9 : vector<16x64xf32> to vector<16x64xbf16>
    %c0_7 = arith.constant 0 : index
    %c0_8 = arith.constant 0 : index
    %11 = vector.load %arg5[%c0_7, %c0_8] : memref<16x64xbf16, #tpu.memory_space<vmem>>, vector<16x64xbf16>
    tpu.vector_store %arg5[%c0_7, %c0_8], %10 {strides = array<i32>} : memref<16x64xbf16, #tpu.memory_space<vmem>>, vector<16x64xbf16>,
    %12 = vector.extract_strided_slice %5 {offsets = [0, 128], sizes = [16, 64], strides = [1, 1]} : vector<16x256xf32> to vector<16x64xf32>
    %13 = arith.truncf %12 : vector<16x64xf32> to vector<16x64xbf16>
    %c0_9 = arith.constant 0 : index
    %c0_10 = arith.constant 0 : index
    %14 = vector.load %arg6[%c0_9, %c0_10] : memref<16x64xbf16, #tpu.memory_space<vmem>>, vector<16x64xbf16>
    tpu.vector_store %arg6[%c0_9, %c0_10], %13 {strides = array<i32>} : memref<16x64xbf16, #tpu.memory_space<vmem>>, vector<16x64xbf16>,
    %15 = vector.extract_strided_slice %5 {offsets = [0, 192], sizes = [16, 64], strides = [1, 1]} : vector<16x256xf32> to vector<16x64xf32>
    %c0_11 = arith.constant 0 : index
    %c0_12 = arith.constant 0 : index
    %16 = vector.load %arg7[%c0_11, %c0_12] : memref<16x64xf32, #tpu.memory_space<vmem>>, vector<16x64xf32>
    tpu.vector_store %arg7[%c0_11, %c0_12], %15 {strides = array<i32>} : memref<16x64xf32, #tpu.memory_space<vmem>>, vector<16x64xf32>,
    return
  }
  func.func @transform_0(%arg0: i32) -> (i32, i32) {
    %c0_i32 = arith.constant 0 : i32
    %c0_i32_0 = arith.constant 0 : i32
    return %arg0, %c0_i32 : i32, i32
  }
  func.func @transform_1(%arg0: i32) -> (i32, i32) {
    %c0_i32 = arith.constant 0 : i32
    %c0_i32_0 = arith.constant 0 : i32
    %c0_i32_1 = arith.constant 0 : i32
    return %c0_i32, %c0_i32_0 : i32, i32
  }
  func.func @transform_2(%arg0: i32) -> (i32, i32) {
    %c0_i32 = arith.constant 0 : i32
    %c0_i32_0 = arith.constant 0 : i32
    %c0_i32_1 = arith.constant 0 : i32
    return %c0_i32, %c0_i32_0 : i32, i32
  }
  func.func @transform_3(%arg0: i32) -> (i32, i32) {
    %c0_i32 = arith.constant 0 : i32
    %c0_i32_0 = arith.constant 0 : i32
    return %arg0, %c0_i32 : i32, i32
  }
  func.func @transform_4(%arg0: i32) -> (i32, i32) {
    %c0_i32 = arith.constant 0 : i32
    %c0_i32_0 = arith.constant 0 : i32
    return %arg0, %c0_i32 : i32, i32
  }
  func.func @transform_5(%arg0: i32) -> (i32, i32) {
    %c0_i32 = arith.constant 0 : i32
    %c0_i32_0 = arith.constant 0 : i32
    return %arg0, %c0_i32 : i32, i32
  }
  func.func @transform_6(%arg0: i32) -> (i32, i32) {
    %c0_i32 = arith.constant 0 : i32
    %c0_i32_0 = arith.constant 0 : i32
    return %arg0, %c0_i32 : i32, i32
  }
}

</mosaic_0001>

<bundles_post_ra>
// kernel: tpu_custom_call.1
= control target key start
LH: loop header
LB: loop body
LE: loop exit
PB: predicated region body
PF: predicated region fallthrough
CT: control target
= control target key end

     0   :  { %12 = vsyncpa [#allocation3], 0  ;;  %s565_s0 = inlined_call_operand.hbm [shape: bf16[16,16], index: 0, kind: input, shape index: {}]   ;;  %s566_s1 = inlined_call_operand.hbm [shape: bf16[16,256], index: 1, kind: input, shape index: {}]   ;;  %s567_s2 = inlined_call_operand.vmem [shape: f32[1,256], index: 2, kind: input, shape index: {}]   ;;  %s568_s3 = inlined_call_operand.hbm [shape: bf16[16,64], index: 3, kind: output, shape index: {0}]   ;;  %s569_s4 = inlined_call_operand.hbm [shape: bf16[16,64], index: 4, kind: output, shape index: {1}]   ;;  %s570_s5 = inlined_call_operand.hbm [shape: bf16[16,64], index: 5, kind: output, shape index: {2}]   ;;  %s571_s6 = inlined_call_operand.hbm [shape: f32[16,64], index: 6, kind: output, shape index: {3}]  }
   0x1   :  { %13 = vsyncpa [#allocation6], 0 }
   0x2   :  { %14 = vsyncpa [#allocation4], 0 }
   0x3   :  { %15 = vsyncpa [#allocation9], 0 }
   0x4   :  { %16 = vsyncpa [#allocation12], 0  ;;  %s402_s21 = smov [#allocation2]   ;;  %s260_s25 = scalar_lea.hbm %s565_s0, 128 }
   0x5   :  { %s22_s22 = sshll.u32 %s402_s21, 4  ;;  %p261_p0 = scmp.ne.s32.totalorder %s565_s0, %s260_s25  ;;  %s23_s22 = int_to_ptr.vmem [resolvable:$true] %s22_s22 }
   0x6   :  { %p264_p1 = scmp.lt.u32.totalorder %s260_s25, %s565_s0 }
   0x8   :  { %p266_p2 = pnand %p264_p1, %p261_p0 }
   0xa   :  { %269 = shalt.err (!%p266_p2)
}
   0xb   :  { %s270_s30 = scalar_lea.vmem %s23_s22, 128  ;;  %p275_p4 = scmp.lt.s32.totalorder %s23_s22, %s23_s22 }
   0xc   :  { %p271_p3 = scmp.ne.s32.totalorder %s23_s22, %s270_s30  ;;  %p276_p5 = scmp.lt.s32.totalorder %s270_s30, %s270_s30 }
   0xe   :  { %p277_p6 = por %p276_p5, %p275_p4 }
  0x10   :  { %p278_p7 = pnand %p277_p6, %p271_p3 }
  0x12   :  { %281 = shalt.err (!%p278_p7)
}
  0x13   :  { %s403_s7 = smov 64   ;;  %s404_s8 = smov 4  }
  0x14   :  { %28 = dma.hbm_to_vmem [thread:$0]  %s565_s0, 128, %s23_s22, [#allocation3], %s403_s7, %s403_s7, %s404_s8  }
  0x15   :  { %s405_s11 = smov [#allocation5]   ;;  %s282_s15 = scalar_lea.hbm %s566_s1, 256 }
  0x16   :  { %s34_s12 = sshll.u32 %s405_s11, 4  ;;  %p283_p8 = scmp.ne.s32.totalorder %s566_s1, %s282_s15  ;;  %s35_s12 = int_to_ptr.vmem [resolvable:$true] %s34_s12 }
  0x17   :  { %p286_p9 = scmp.lt.u32.totalorder %s282_s15, %s566_s1 }
  0x19   :  { %p288_p10 = pnand %p286_p9, %p283_p8 }
  0x1b   :  { %291 = shalt.err (!%p288_p10)
}
  0x1c   :  { %s292_s20 = scalar_lea.vmem %s35_s12, 256  ;;  %p297_p12 = scmp.lt.s32.totalorder %s35_s12, %s35_s12 }
  0x1d   :  { %p293_p11 = scmp.ne.s32.totalorder %s35_s12, %s292_s20  ;;  %p298_p13 = scmp.lt.s32.totalorder %s292_s20, %s292_s20 }
  0x1f   :  { %p299_p0 = por %p298_p13, %p297_p12 }
  0x21   :  { %p300_p1 = pnand %p299_p0, %p293_p11 }
  0x23   :  { %303 = shalt.err (!%p300_p1)
}
  0x24   :  { %s406_s0 = smov 128   ;;  %s407_s21 = smov 8  }
  0x25   :  { %40 = dma.hbm_to_vmem [thread:$0]  %s566_s1, 256, %s35_s12, [#allocation6], %s406_s0, %s406_s0, %s407_s21  }
  0x26   :  { %392 = dma.done.wait [#allocation3], 128  }
  0x27   :  { %393 = vsyncadd [#allocation3], 4294967168 }
  0x28   :  { %394 = dma.done.wait [#allocation6], 256  }
  0x29   :  { %395 = vsyncadd [#allocation6], 4294967040  ;;  %v408_v0 = vmov 0   ;;  %v256_v1 = vld [vmem:[#allocation5 + $0x4] ss:$8 sps:$4 sm:$0xff]   ;;  %v259_v3 = vld [vmem:[#allocation2] sm:$0xff]   ;;  %v56_v4 = vlaneseq }
  0x2a   :  { %117 = vmatprep.mubr.bf16.mxu0 %v408_v0  ;;  %v258_v2 = vld [vmem:[#allocation5] ss:$8 sps:$4 sm:$0xff]   ;;  %85 = vmatprep.subr.bf16.mxu0 %v256_v1  ;;  %vm81_vm0 = vcmask 130048   ;;  %v54_v7 = vld [vmem:[%s567_s2] sm:$0x3]  ;;  %vm136_vm1 = vcmask 519168  }
  0x2b   :  { %86 = vmatpush1.bf16.msra.mxu0 %v258_v2  ;;  %v57_v5 = vshrl.u32 %v56_v4, 7  ;;  %s409_s1 = smov [#allocation7]  }
  0x2c   :  { %s173_s26 = sshll.u32 %s409_s1, 4  ;;  %s174_s26 = int_to_ptr.vmem [resolvable:$true] %s173_s26 }
  0x2d   :  { %v58_v6 = vsub.s32 0, %v57_v5  ;;  %v62_v8 = vsub.s32 1, %v57_v5  ;;  %s304_s2 = scalar_lea.vmem %s174_s26, 128  ;;  %p309_p3 = scmp.lt.s32.totalorder %s174_s26, %s174_s26 }
  0x2e   :  { %236 = vmatmul.mubr.msk.bf16.vlgmr.msra.gmra.mrb[0].mxu0 %vm81_vm0, %v259_v3  ;;  %p305_p2 = scmp.ne.s32.totalorder %s174_s26, %s304_s2  ;;  %p310_p4 = scmp.lt.s32.totalorder %s304_s2, %s304_s2 }
  0x2f   :  { %v59_v9 = vrot.slane %v54_v7, %v58_v6  ;;  %v63_v10 = vrot.slane %v54_v7, %v62_v8 }
  0x30   :  { %p311_p5 = por %p310_p4, %p309_p3 }
  0x32   :  { %p312_p6 = pnand %p311_p5, %p305_p2 }
 0x101   :  { %v119_v11 = vpop.f32.mrb[0].mxu0 }
 0x102   :  { %v120_v12 = vadd.f32 %v119_v11, %v59_v9  ;;  %v121_v13 = vpop.f32.mrb[1].mxu0 }
 0x103   :  { %v122_v14 = vadd.f32 %v121_v13, %v63_v10  ;;  %v123_v15 = vpop.f32.mrb[2].mxu0 }
 0x104   :  { %v241_v16 = vpack.c.bf16 %v120_v12, %v120_v12  ;;  %v124_v17 = vadd.f32 %v123_v15, %v59_v9  ;;  %v125_v18 = vpop.f32.mrb[3].mxu0 }
 0x105   :  { %v243_v19 = vpack.c.bf16 %v122_v14, %v122_v14  ;;  %v126_v20 = vadd.f32 %v125_v18, %v63_v10  ;;  %159 = vrot.lane.b32.xlu1 %v122_v14, %s403_s7 }
 0x106   :  { %v242_v21 = vpack.c.bf16 %v124_v17, %v124_v17  ;;  %139 = vrot.lane.b32.xlu0 %v241_v16, %s403_s7  ;;  %137 = vst.msk [vmem:[#allocation7] sm:$0xf] %vm136_vm1, %v241_v16 }
 0x107   :  { %v244_v22 = vpack.c.bf16 %v126_v20, %v126_v20  ;;  %155 = vst.msk [vmem:[#allocation10] sm:$0xf] %vm136_vm1, %v243_v19 }
 0x108   :  { %138 = vst.msk [vmem:[#allocation7 + $0x4] sm:$0xf] %vm136_vm1, %v242_v21 }
 0x109   :  { %161 = vrot.lane.b32.xlu1 %v126_v20, %s403_s7  ;;  %156 = vst.msk [vmem:[#allocation10 + $0x4] sm:$0xf] %vm136_vm1, %v244_v22 }
 0x10a   :  { %141 = vrot.lane.b32.xlu0 %v242_v21, %s403_s7 }
 0x10b   :  { %315 = shalt.err (!%p312_p6)
}
 0x10c   :  { %s316_s29 = scalar_lea.hbm %s568_s3, 128 }
 0x10d   :  { %p317_p7 = scmp.ne.s32.totalorder %s568_s3, %s316_s29  ;;  %p320_p8 = scmp.lt.u32.totalorder %s316_s29, %s568_s3 }
 0x10f   :  { %p322_p9 = pnand %p320_p8, %p317_p7 }
 0x111   :  { %325 = shalt.err (!%p322_p9)
}
 0x112   :  { %179 = dma.vmem_to_hbm [thread:$0]  %s174_s26, 128, %s568_s3, [#allocation4], %s403_s7, %s403_s7, %s404_s8   ;;  %vm165_vm2 = vcmask 523264  }
 0x113   :  { %s410_s14 = smov [#allocation11]   ;;  %s411_s16 = smov [#allocation8]  }
 0x114   :  { %s209_s15 = sshll.u32 %s410_s14, 4  ;;  %s185_s17 = sshll.u32 %s411_s16, 4  ;;  %s210_s15 = int_to_ptr.vmem [resolvable:$true] %s209_s15  ;;  %s505_s17 = int_to_ptr.vmem [resolvable:$true] %s185_s17 }
 0x115   :  { %s412_s18 = smov [#allocation10]   ;;  %s326_s3 = scalar_lea.vmem %s210_s15, 256 }
 0x116   :  { %s197_s19 = sshll.u32 %s412_s18, 4  ;;  %p327_p10 = scmp.ne.s32.totalorder %s210_s15, %s326_s3  ;;  %s507_s19 = int_to_ptr.vmem [resolvable:$true] %s197_s19 }
 0x117   :  { %p331_p11 = scmp.lt.s32.totalorder %s210_s15, %s210_s15  ;;  %p332_p12 = scmp.lt.s32.totalorder %s326_s3, %s326_s3 }
 0x119   :  { %p333_p13 = por %p332_p12, %p331_p11 }
 0x11b   :  { %p334_p0 = pnand %p333_p13, %p327_p10 }
 0x177   :  { %v160_v23 = vpop.permute.xlu1 %159 }
 0x178   :  { %166 = vst.msk [vmem:[#allocation11] sm:$0xff] %vm165_vm2, %v160_v23  ;;  %v140_v24 = vpop.permute.xlu0 %139 }
 0x179   :  { %145 = vst.msk [vmem:[#allocation8] sm:$0xf] %vm136_vm1, %v140_v24 }
 0x17b   :  { %v162_v25 = vpop.permute.xlu1 %161 }
 0x17c   :  { %167 = vst.msk [vmem:[#allocation11 + $0x8] sm:$0xff] %vm165_vm2, %v162_v25  ;;  %v142_v26 = vpop.permute.xlu0 %141 }
 0x17d   :  { %146 = vst.msk [vmem:[#allocation8 + $0x4] sm:$0xf] %vm136_vm1, %v142_v26 }
 0x17e   :  { %337 = shalt.err (!%p334_p0)
}
 0x17f   :  { %s338_s23 = scalar_lea.hbm %s571_s6, 256 }
 0x180   :  { %p339_p1 = scmp.ne.s32.totalorder %s571_s6, %s338_s23  ;;  %p342_p2 = scmp.lt.u32.totalorder %s338_s23, %s571_s6 }
 0x182   :  { %p344_p3 = pnand %p342_p2, %p339_p1 }
 0x184   :  { %347 = shalt.err (!%p344_p3)
}
 0x185   :  { %215 = dma.vmem_to_hbm [thread:$0]  %s210_s15, 256, %s571_s6, [#allocation12], %s406_s0, %s406_s0, %s407_s21  }
 0x186   :  { %s348_s28 = scalar_lea.vmem %s505_s17, 128  ;;  %p353_p5 = scmp.lt.s32.totalorder %s505_s17, %s505_s17 }
 0x187   :  { %p349_p4 = scmp.ne.s32.totalorder %s505_s17, %s348_s28  ;;  %p354_p6 = scmp.lt.s32.totalorder %s348_s28, %s348_s28 }
 0x189   :  { %p355_p7 = por %p354_p6, %p353_p5 }
 0x18b   :  { %p356_p8 = pnand %p355_p7, %p349_p4 }
 0x18d   :  { %359 = shalt.err (!%p356_p8)
}
 0x18e   :  { %s360_s9 = scalar_lea.hbm %s569_s4, 128 }
 0x18f   :  { %p361_p9 = scmp.ne.s32.totalorder %s569_s4, %s360_s9  ;;  %p364_p10 = scmp.lt.u32.totalorder %s360_s9, %s569_s4 }
 0x191   :  { %p366_p11 = pnand %p364_p10, %p361_p9 }
 0x193   :  { %369 = shalt.err (!%p366_p11)
}
 0x194   :  { %191 = dma.vmem_to_hbm [thread:$0]  %s505_s17, 128, %s569_s4, [#allocation9], %s403_s7, %s403_s7, %s404_s8  }
 0x195   :  { %s370_s21 = scalar_lea.vmem %s507_s19, 128  ;;  %p375_p13 = scmp.lt.s32.totalorder %s507_s19, %s507_s19 }
 0x196   :  { %p371_p12 = scmp.ne.s32.totalorder %s507_s19, %s370_s21  ;;  %p376_p0 = scmp.lt.s32.totalorder %s370_s21, %s370_s21 }
 0x198   :  { %p377_p1 = por %p376_p0, %p375_p13 }
 0x19a   :  { %p378_p2 = pnand %p377_p1, %p371_p12 }
 0x19c   :  { %381 = shalt.err (!%p378_p2)
}
 0x19d   :  { %s382_s16 = scalar_lea.hbm %s570_s5, 128 }
 0x19e   :  { %p383_p3 = scmp.ne.s32.totalorder %s570_s5, %s382_s16  ;;  %p386_p4 = scmp.lt.u32.totalorder %s382_s16, %s570_s5 }
 0x1a0   :  { %p388_p5 = pnand %p386_p4, %p383_p3 }
 0x1a2   :  { %391 = shalt.err (!%p388_p5)
}
 0x1a3   :  { %203 = dma.vmem_to_hbm [thread:$0]  %s507_s19, 128, %s570_s5, [#allocation9], %s403_s7, %s403_s7, %s404_s8  }
 0x1a4   :  { %396 = dma.done.wait [#allocation4], 128  }
 0x1a5   :  { %397 = vsyncadd [#allocation4], 4294967168 }
 0x1a6   :  { %398 = dma.done.wait [#allocation9], 256  }
 0x1a7   :  { %399 = vsyncadd [#allocation9], 4294967040 }
 0x1a8   :  { %400 = dma.done.wait [#allocation12], 256  }
 0x1a9   :  { %401 = vsyncadd [#allocation12], 4294967040 }
 0x1aa   :  { %228 = vsyncpa [#allocation3], 1 }
 0x1ab   :  { %229 = vsyncpa [#allocation6], 1 }
 0x1ac   :  { %230 = vsyncpa [#allocation4], 1 }
 0x1ad   :  { %231 = vsyncpa [#allocation9], 1 }
 0x1ae   :  { %232 = vsyncpa [#allocation12], 1 }

</bundles_post_ra>
